<compile_context>
chip_gen: v7x
topology: tpu7x:2x2x1
jax: 0.10.0
libtpu: 0.0.40
codegen_flags: <defaults>
</compile_context>

<pallas_src>
import functools
import math

import jax
import jax.numpy as jnp
from jax.experimental import pallas as pl
from jax.experimental.pallas import tpu as pltpu


def _psd_kernel(*refs, C, normalize, eps, use_mask):
    """One grid step: (C, Fblk, 2T) interleaved spectrum tile -> (Fblk, 2*C*C) tile."""
    if use_mask:
        x_ref, m_ref, o_ref = refs
    else:
        x_ref, o_ref = refs

    fblk = x_ref.shape[1]
    K = x_ref.shape[2]  # = 2*T; even lanes carry real parts, odd lanes imaginary parts

    lane = jax.lax.broadcasted_iota(jnp.int32, (fblk, K), 1)
    even = (lane & 1) == 0

    # Mask weights (applied once per channel, not once per pair) and the exact
    # normalization scale, applied after the time reduction.
    scale = None
    if use_mask:
        m2 = m_ref[...]  # (fblk, K): w[f, t] duplicated onto its (re, im) lane pair
        if normalize:
            denom = 0.5 * jnp.sum(m2, axis=-1, keepdims=True) + eps  # = sum_t m + eps
            scale = 1.0 / denom                                      # exact reciprocal
        xm = [m2 * x_ref[c] for c in range(C)]   # hoisted channel loads + mask apply
    else:
        xm = [x_ref[c] for c in range(C)]        # hoisted channel loads

    re_cols = [[None] * C for _ in range(C)]
    im_cols = [[None] * C for _ in range(C)]
    zero = jnp.zeros((fblk, 1), jnp.float32)

    for e in range(C):
        x_e = x_ref[e]
        # Pair-swapped / negated copy:  y_e[2t] = -b_e[t], y_e[2t+1] = a_e[t], so that
        #   sum_k x_c[k] * y_e[k] = sum_t (b_c a_e - a_c b_e) = Im(z_c * conj(z_e)).
        # jnp.roll (numpy semantics) lowers to lane-dim slices + concatenate.
        r_left = jnp.roll(x_e, -1, axis=-1)    # x_e[k+1] -> k : imag at even lanes
        r_right = jnp.roll(x_e, 1, axis=-1)    # x_e[k-1] -> k : real at odd lanes
        y_e = jnp.where(even, -r_left, r_right)

        for c in range(e + 1):
            # Re(z_c conj z_e): sum over the interleaved axis of (w * x_c) * x_e.
            re = jnp.sum(xm[c] * x_e, axis=-1, keepdims=True)  # (fblk, 1)
            if scale is not None:
                re = re * scale
            re_cols[c][e] = re
            re_cols[e][c] = re  # Hermitian mirror
            if c < e:
                im = jnp.sum(xm[c] * y_e, axis=-1, keepdims=True)
                if scale is not None:
                    im = im * scale
                im_cols[c][e] = im
                im_cols[e][c] = -im
        im_cols[e][e] = zero  # imaginary diagonal is exactly zero

    # Packed-column order (first C*C real entries, then C*C imaginary entries),
    # concatenated once and written with a single dense store.
    packed = jnp.concatenate(
        [re_cols[c][e] for c in range(C) for e in range(C)]
        + [im_cols[c][e] for c in range(C) for e in range(C)],
        axis=-1,
    )
    o_ref[...] = packed


def _interleaved_f32_view(spec):
    """(B, C, F, T) complex64 -> (B, C, F, 2T) float32 with re/im interleaved."""
    B, C, F, T = spec.shape
    try:
        # Free reinterpretation of the complex buffer when the installed JAX allows it.
        x = jax.lax.bitcast_convert_type(spec, jnp.float32)          # (B, C, F, T, 2)
    except (TypeError, NotImplementedError):
        # TODO(synk): lax.bitcast_convert_type rejects complex dtypes today; this
        # fallback costs ONE fused HBM pass (read spec, write interleaved f32 copy).
        x = jnp.stack([jnp.real(spec), jnp.imag(spec)], axis=-1)     # (B, C, F, T, 2)
    return x.reshape(B, C, F, 2 * T)


def _vmem_budget_bytes():
    """Per-generation input-tile budget (tight on v5e; v7x has 64 MiB VMEM per TC)."""
    kind = ""
    try:
        kind = jax.devices()[0].device_kind.lower()
    except Exception:
        pass
    if "v5 lite" in kind or "v5e" in kind or "v5litepod" in kind:
        return 12 * 1024 * 1024
    return 20 * 1024 * 1024


def psd(specgram, mask=None, *, multi_mask=False, normalize=True, eps=1e-15):
    """JAX/Pallas equivalent of torchaudio.transforms.PSD.forward."""
    *batch, C, F, T = specgram.shape
    B = math.prod(batch) if batch else 1

    spec = specgram.reshape(B, C, F, T)
    if spec.dtype != jnp.complex64:
        # TODO(synk): complex128 inputs are downcast to complex64 (Mosaic is f32-only).
        spec = spec.astype(jnp.complex64)
    x = _interleaved_f32_view(spec)                 # (B, C, F, 2T), no layout change
    K = 2 * T
    CC = C * C

    use_mask = mask is not None
    m2 = None
    if use_mask:
        if multi_mask:
            mask = mask.mean(axis=-3)
        m = mask.astype(jnp.float32).reshape(B, F, T)
        # Duplicate each weight onto its (re, im) lane pair to match the interleaved
        # spectrum layout (small: ~1/C of the spectrogram bytes).
        m2 = jnp.repeat(m, 2, axis=-1)              # (B, F, 2T)

    # ---- freq-block sizing against an explicit VMEM working-set model -------------
    def ws_bytes(fblk):
        spec_b = 2 * C * fblk * K * 4                          # double-buffered input
        mask_b = 2 * fblk * K * 4 if use_mask else 0           # double-buffered mask
        out_b = 2 * fblk * 2 * CC * 4                          # double-buffered output
        temps = ((C + 4) if use_mask else 4) * fblk * K * 4    # in-kernel temporaries
        return spec_b + mask_b + out_b + temps

    budget = _vmem_budget_bytes()
    rows = max(1, budget // max(1, ws_bytes(1)))
    fblk = min(F, 512, max(8, (rows // 8) * 8))     # partial blocks stay 8-aligned
    # Feed both v7x TensorCores: single-batch inputs get at least 2 grid steps.
    if B * pl.cdiv(F, fblk) < 2 and F > 8:
        fblk = min(fblk, max(8, (((F + 1) // 2) + 7) // 8 * 8))
    G = pl.cdiv(F, fblk)

    in_specs = [pl.BlockSpec((None, C, fblk, K), lambda b, g: (b, 0, g, 0))]
    args = [x]
    if use_mask:
        in_specs.append(pl.BlockSpec((None, fblk, K), lambda b, g: (b, g, 0)))
        args.append(m2)

    kernel = functools.partial(
        _psd_kernel, C=C, normalize=normalize, eps=eps, use_mask=use_mask
    )

    vmem_limit = int(min(max(2 * ws_bytes(fblk), 16 * 1024 * 1024), 48 * 1024 * 1024))

    out = pl.pallas_call(
        kernel,
        out_shape=jax.ShapeDtypeStruct((B, F, 2 * CC), jnp.float32),
        grid=(B, G),
        in_specs=in_specs,
        out_specs=pl.BlockSpec((None, fblk, 2 * CC), lambda b, g: (b, g, 0)),
        compiler_params=pltpu.CompilerParams(
            dimension_semantics=("parallel", "parallel"),
            vmem_limit_bytes=vmem_limit,
        ),
    )(*args)

    # (B, F, 2*C*C) -> (B, F, 2, C, C) -> complex (..., F, C, C)
    out = out.reshape(B, F, 2, C, C)
    psd_mat = jax.lax.complex(out[:, :, 0], out[:, :, 1])
    return psd_mat.reshape(*batch, F, C, C)


def _psd_reference(specgram, mask=None, *, multi_mask=False, normalize=True, eps=1e-15):
    """Pure-JAX reference mirroring torchaudio.functional.psd."""
    spec = jnp.swapaxes(specgram, -3, -2)  # (..., freq, channel, time)
    outer = jnp.einsum("...ct,...et->...tce", spec, jnp.conj(spec))
    if mask is not None:
        if multi_mask:
            mask = mask.mean(axis=-3)
        if normalize:
            mask = mask / (mask.sum(axis=-1, keepdims=True) + eps)
        outer = outer * mask[..., None, None]
    return outer.sum(axis=-3)


if __name__ == "__main__":
    key = jax.random.PRNGKey(0)
    k1, k2, k3, k4 = jax.random.split(key, 4)

    batch, channel, freq, time = 2, 4, 16, 8
    spec_re = jax.random.normal(k1, (batch, channel, freq, time), dtype=jnp.float32)
    spec_im = jax.random.normal(k2, (batch, channel, freq, time), dtype=jnp.float32)
    specgram = jax.lax.complex(spec_re, spec_im)            # (..., channel, freq, time)
    mask = jax.random.uniform(k3, (batch, freq, time), dtype=jnp.float32)

    # Masked + normalized (default PSD-module path); exact reciprocal -> tight tol.
    out = jax.block_until_ready(psd(specgram, mask))
    ref = _psd_reference(specgram, mask)
    assert out.shape == (batch, freq, channel, channel)
    assert jnp.allclose(out, ref, atol=1e-4, rtol=1e-4)

    # No mask: dedicated pallas_call variant without the mask operand.
    out2 = jax.block_until_ready(psd(specgram, None))
    ref2 = _psd_reference(specgram, None)
    assert jnp.allclose(out2, ref2, atol=1e-4, rtol=1e-4)

    # Multi-channel mask (multi_mask=True).
    mc_mask = jax.random.uniform(k4, (batch, channel, freq, time), dtype=jnp.float32)
    out3 = jax.block_until_ready(psd(specgram, mc_mask, multi_mask=True))
    ref3 = _psd_reference(specgram, mc_mask, multi_mask=True)
    assert jnp.allclose(out3, ref3, atol=1e-4, rtol=1e-4)

    # Non-divisible freq count: exercises the ragged last block and the >=2-grid-step
    # (two-TensorCore) split, with no host-side padding.
    freq2 = 257
    s_re = jax.random.normal(k1, (1, channel, freq2, time), dtype=jnp.float32)
    s_im = jax.random.normal(k2, (1, channel, freq2, time), dtype=jnp.float32)
    spec2 = jax.lax.complex(s_re, s_im)
    mask2 = jax.random.uniform(k3, (1, freq2, time), dtype=jnp.float32)
    out4 = jax.block_until_ready(psd(spec2, mask2))
    ref4 = _psd_reference(spec2, mask2)
    assert out4.shape == (1, freq2, channel, channel)
    assert jnp.allclose(out4, ref4, atol=1e-4, rtol=1e-4)

    print("KERNEL_OK")
</pallas_src>

<mosaic_0001>
module attributes {stable_mosaic.version = 11 : i64} {
  func.func @_psd_kernel(%arg0: i32, %arg1: i32, %arg2: memref<1x4x16x16xf32, #tpu.memory_space<vmem>>, %arg3: memref<1x16x16xf32, #tpu.memory_space<vmem>>, %arg4: memref<1x16x32xf32, #tpu.memory_space<vmem>>) attributes {dimension_semantics = [#tpu.dimension_semantics<parallel>, #tpu.dimension_semantics<parallel>], iteration_bounds = array<i64: 2, 1>, scalar_prefetch = 0 : i64, scratch_operands = 0 : i64, tpu.core_type = #tpu.core_type<tc>, window_params = [{transform_indices = @transform_0, window_bounds = array<i64: 1, 4, 16, 16>}, {transform_indices = @transform_1, window_bounds = array<i64: 1, 16, 16>}, {transform_indices = @transform_2, window_bounds = array<i64: 1, 16, 32>}]} {
    %0 = tpu.iota {dimensions = array<i32: 1>} : vector<16x16xi32>
    %c1_i32 = arith.constant 1 : i32
    %1 = vector.broadcast %c1_i32 : i32 to vector<16x16xi32>
    %2 = arith.andi %0, %1 : vector<16x16xi32>
    %c0_i32 = arith.constant 0 : i32
    %3 = vector.broadcast %c0_i32 : i32 to vector<16x16xi32>
    %4 = arith.cmpi eq, %2, %3 : vector<16x16xi32>
    %c0 = arith.constant 0 : index
    %c0_0 = arith.constant 0 : index
    %c0_1 = arith.constant 0 : index
    %5 = vector.load %arg3[%c0, %c0_0, %c0_1] : memref<1x16x16xf32, #tpu.memory_space<vmem>>, vector<1x16x16xf32>
    %6 = vector.shape_cast %5 : vector<1x16x16xf32> to vector<16x16xf32>
    %cst = arith.constant dense<0.000000e+00> : vector<16xf32>
    %7 = vector.multi_reduction <add>, %6, %cst [1] : vector<16x16xf32> to vector<16xf32>
    %8 = vector.shape_cast %7 : vector<16xf32> to vector<16x1xf32>
    %cst_2 = arith.constant 5.000000e-01 : f32
    %9 = vector.broadcast %cst_2 : f32 to vector<16x1xf32>
    %10 = arith.mulf %9, %8 : vector<16x1xf32>
    %cst_3 = arith.constant 1.000000e-15 : f32
    %11 = vector.broadcast %cst_3 : f32 to vector<16x1xf32>
    %12 = arith.addf %10, %11 : vector<16x1xf32>
    %cst_4 = arith.constant 1.000000e+00 : f32
    %13 = vector.broadcast %cst_4 : f32 to vector<16x1xf32>
    %14 = arith.divf %13, %12 : vector<16x1xf32>
    %c0_5 = arith.constant 0 : index
    %c0_6 = arith.constant 0 : index
    %c0_7 = arith.constant 0 : index
    %c0_8 = arith.constant 0 : index
    %15 = vector.load %arg2[%c0_5, %c0_6, %c0_7, %c0_8] : memref<1x4x16x16xf32, #tpu.memory_space<vmem>>, vector<1x1x16x16xf32>
    %16 = vector.shape_cast %15 : vector<1x1x16x16xf32> to vector<16x16xf32>
    %17 = arith.mulf %6, %16 : vector<16x16xf32>
    %c0_9 = arith.constant 0 : index
    %c1 = arith.constant 1 : index
    %c0_10 = arith.constant 0 : index
    %c0_11 = arith.constant 0 : index
    %18 = vector.load %arg2[%c0_9, %c1, %c0_10, %c0_11] : memref<1x4x16x16xf32, #tpu.memory_space<vmem>>, vector<1x1x16x16xf32>
    %19 = vector.shape_cast %18 : vector<1x1x16x16xf32> to vector<16x16xf32>
    %20 = arith.mulf %6, %19 : vector<16x16xf32>
    %c0_12 = arith.constant 0 : index
    %c2 = arith.constant 2 : index
    %c0_13 = arith.constant 0 : index
    %c0_14 = arith.constant 0 : index
    %21 = vector.load %arg2[%c0_12, %c2, %c0_13, %c0_14] : memref<1x4x16x16xf32, #tpu.memory_space<vmem>>, vector<1x1x16x16xf32>
    %22 = vector.shape_cast %21 : vector<1x1x16x16xf32> to vector<16x16xf32>
    %23 = arith.mulf %6, %22 : vector<16x16xf32>
    %c0_15 = arith.constant 0 : index
    %c3 = arith.constant 3 : index
    %c0_16 = arith.constant 0 : index
    %c0_17 = arith.constant 0 : index
    %24 = vector.load %arg2[%c0_15, %c3, %c0_16, %c0_17] : memref<1x4x16x16xf32, #tpu.memory_space<vmem>>, vector<1x1x16x16xf32>
    %25 = vector.shape_cast %24 : vector<1x1x16x16xf32> to vector<16x16xf32>
    %26 = arith.mulf %6, %25 : vector<16x16xf32>
    %cst_18 = arith.constant 0.000000e+00 : f32
    %27 = vector.broadcast %cst_18 : f32 to vector<16x1xf32>
    %c0_19 = arith.constant 0 : index
    %c0_20 = arith.constant 0 : index
    %c0_21 = arith.constant 0 : index
    %c0_22 = arith.constant 0 : index
    %28 = vector.load %arg2[%c0_19, %c0_20, %c0_21, %c0_22] : memref<1x4x16x16xf32, #tpu.memory_space<vmem>>, vector<1x1x16x16xf32>
    %29 = vector.shape_cast %28 : vector<1x1x16x16xf32> to vector<16x16xf32>
    %30 = arith.mulf %17, %29 : vector<16x16xf32>
    %cst_23 = arith.constant dense<0.000000e+00> : vector<16xf32>
    %31 = vector.multi_reduction <add>, %30, %cst_23 [1] : vector<16x16xf32> to vector<16xf32>
    %32 = vector.shape_cast %31 : vector<16xf32> to vector<16x1xf32>
    %33 = arith.mulf %32, %14 : vector<16x1xf32>
    %c0_24 = arith.constant 0 : index
    %c1_25 = arith.constant 1 : index
    %c0_26 = arith.constant 0 : index
    %c0_27 = arith.constant 0 : index
    %34 = vector.load %arg2[%c0_24, %c1_25, %c0_26, %c0_27] : memref<1x4x16x16xf32, #tpu.memory_space<vmem>>, vector<1x1x16x16xf32>
    %35 = vector.shape_cast %34 : vector<1x1x16x16xf32> to vector<16x16xf32>
    %36 = vector.extract_strided_slice %35 {offsets = [0, 1], sizes = [16, 15], strides = [1, 1]} : vector<16x16xf32> to vector<16x15xf32>
    %37 = vector.extract_strided_slice %35 {offsets = [0, 0], sizes = [16, 1], strides = [1, 1]} : vector<16x16xf32> to vector<16x1xf32>
    %38 = tpu.concatenate %36, %37 in 1 : vector<16x15xf32>, vector<16x1xf32> -> vector<16x16xf32>
    %39 = vector.extract_strided_slice %35 {offsets = [0, 15], sizes = [16, 1], strides = [1, 1]} : vector<16x16xf32> to vector<16x1xf32>
    %40 = vector.extract_strided_slice %35 {offsets = [0, 0], sizes = [16, 15], strides = [1, 1]} : vector<16x16xf32> to vector<16x15xf32>
    %41 = tpu.concatenate %39, %40 in 1 : vector<16x1xf32>, vector<16x15xf32> -> vector<16x16xf32>
    %cst_28 = arith.constant 0.000000e+00 : f32
    %42 = vector.broadcast %cst_28 : f32 to vector<16x16xf32>
    %43 = arith.subf %42, %38 : vector<16x16xf32>
    %44 = arith.select %4, %43, %41 : vector<16x16xi1>, vector<16x16xf32>
    %45 = arith.mulf %17, %35 : vector<16x16xf32>
    %cst_29 = arith.constant dense<0.000000e+00> : vector<16xf32>
    %46 = vector.multi_reduction <add>, %45, %cst_29 [1] : vector<16x16xf32> to vector<16xf32>
    %47 = vector.shape_cast %46 : vector<16xf32> to vector<16x1xf32>
    %48 = arith.mulf %47, %14 : vector<16x1xf32>
    %49 = arith.mulf %17, %44 : vector<16x16xf32>
    %cst_30 = arith.constant dense<0.000000e+00> : vector<16xf32>
    %50 = vector.multi_reduction <add>, %49, %cst_30 [1] : vector<16x16xf32> to vector<16xf32>
    %51 = vector.shape_cast %50 : vector<16xf32> to vector<16x1xf32>
    %52 = arith.mulf %51, %14 : vector<16x1xf32>
    %cst_31 = arith.constant 0.000000e+00 : f32
    %53 = vector.broadcast %cst_31 : f32 to vector<16x1xf32>
    %54 = arith.subf %53, %52 : vector<16x1xf32>
    %55 = arith.mulf %20, %35 : vector<16x16xf32>
    %cst_32 = arith.constant dense<0.000000e+00> : vector<16xf32>
    %56 = vector.multi_reduction <add>, %55, %cst_32 [1] : vector<16x16xf32> to vector<16xf32>
    %57 = vector.shape_cast %56 : vector<16xf32> to vector<16x1xf32>
    %58 = arith.mulf %57, %14 : vector<16x1xf32>
    %c0_33 = arith.constant 0 : index
    %c2_34 = arith.constant 2 : index
    %c0_35 = arith.constant 0 : index
    %c0_36 = arith.constant 0 : index
    %59 = vector.load %arg2[%c0_33, %c2_34, %c0_35, %c0_36] : memref<1x4x16x16xf32, #tpu.memory_space<vmem>>, vector<1x1x16x16xf32>
    %60 = vector.shape_cast %59 : vector<1x1x16x16xf32> to vector<16x16xf32>
    %61 = vector.extract_strided_slice %60 {offsets = [0, 1], sizes = [16, 15], strides = [1, 1]} : vector<16x16xf32> to vector<16x15xf32>
    %62 = vector.extract_strided_slice %60 {offsets = [0, 0], sizes = [16, 1], strides = [1, 1]} : vector<16x16xf32> to vector<16x1xf32>
    %63 = tpu.concatenate %61, %62 in 1 : vector<16x15xf32>, vector<16x1xf32> -> vector<16x16xf32>
    %64 = vector.extract_strided_slice %60 {offsets = [0, 15], sizes = [16, 1], strides = [1, 1]} : vector<16x16xf32> to vector<16x1xf32>
    %65 = vector.extract_strided_slice %60 {offsets = [0, 0], sizes = [16, 15], strides = [1, 1]} : vector<16x16xf32> to vector<16x15xf32>
    %66 = tpu.concatenate %64, %65 in 1 : vector<16x1xf32>, vector<16x15xf32> -> vector<16x16xf32>
    %cst_37 = arith.constant 0.000000e+00 : f32
    %67 = vector.broadcast %cst_37 : f32 to vector<16x16xf32>
    %68 = arith.subf %67, %63 : vector<16x16xf32>
    %69 = arith.select %4, %68, %66 : vector<16x16xi1>, vector<16x16xf32>
    %70 = arith.mulf %17, %60 : vector<16x16xf32>
    %cst_38 = arith.constant dense<0.000000e+00> : vector<16xf32>
    %71 = vector.multi_reduction <add>, %70, %cst_38 [1] : vector<16x16xf32> to vector<16xf32>
    %72 = vector.shape_cast %71 : vector<16xf32> to vector<16x1xf32>
    %73 = arith.mulf %72, %14 : vector<16x1xf32>
    %74 = arith.mulf %17, %69 : vector<16x16xf32>
    %cst_39 = arith.constant dense<0.000000e+00> : vector<16xf32>
    %75 = vector.multi_reduction <add>, %74, %cst_39 [1] : vector<16x16xf32> to vector<16xf32>
    %76 = vector.shape_cast %75 : vector<16xf32> to vector<16x1xf32>
    %77 = arith.mulf %76, %14 : vector<16x1xf32>
    %cst_40 = arith.constant 0.000000e+00 : f32
    %78 = vector.broadcast %cst_40 : f32 to vector<16x1xf32>
    %79 = arith.subf %78, %77 : vector<16x1xf32>
    %80 = arith.mulf %20, %60 : vector<16x16xf32>
    %cst_41 = arith.constant dense<0.000000e+00> : vector<16xf32>
    %81 = vector.multi_reduction <add>, %80, %cst_41 [1] : vector<16x16xf32> to vector<16xf32>
    %82 = vector.shape_cast %81 : vector<16xf32> to vector<16x1xf32>
    %83 = arith.mulf %82, %14 : vector<16x1xf32>
    %84 = arith.mulf %20, %69 : vector<16x16xf32>
    %cst_42 = arith.constant dense<0.000000e+00> : vector<16xf32>
    %85 = vector.multi_reduction <add>, %84, %cst_42 [1] : vector<16x16xf32> to vector<16xf32>
    %86 = vector.shape_cast %85 : vector<16xf32> to vector<16x1xf32>
    %87 = arith.mulf %86, %14 : vector<16x1xf32>
    %cst_43 = arith.constant 0.000000e+00 : f32
    %88 = vector.broadcast %cst_43 : f32 to vector<16x1xf32>
    %89 = arith.subf %88, %87 : vector<16x1xf32>
    %90 = arith.mulf %23, %60 : vector<16x16xf32>
    %cst_44 = arith.constant dense<0.000000e+00> : vector<16xf32>
    %91 = vector.multi_reduction <add>, %90, %cst_44 [1] : vector<16x16xf32> to vector<16xf32>
    %92 = vector.shape_cast %91 : vector<16xf32> to vector<16x1xf32>
    %93 = arith.mulf %92, %14 : vector<16x1xf32>
    %c0_45 = arith.constant 0 : index
    %c3_46 = arith.constant 3 : index
    %c0_47 = arith.constant 0 : index
    %c0_48 = arith.constant 0 : index
    %94 = vector.load %arg2[%c0_45, %c3_46, %c0_47, %c0_48] : memref<1x4x16x16xf32, #tpu.memory_space<vmem>>, vector<1x1x16x16xf32>
    %95 = vector.shape_cast %94 : vector<1x1x16x16xf32> to vector<16x16xf32>
    %96 = vector.extract_strided_slice %95 {offsets = [0, 1], sizes = [16, 15], strides = [1, 1]} : vector<16x16xf32> to vector<16x15xf32>
    %97 = vector.extract_strided_slice %95 {offsets = [0, 0], sizes = [16, 1], strides = [1, 1]} : vector<16x16xf32> to vector<16x1xf32>
    %98 = tpu.concatenate %96, %97 in 1 : vector<16x15xf32>, vector<16x1xf32> -> vector<16x16xf32>
    %99 = vector.extract_strided_slice %95 {offsets = [0, 15], sizes = [16, 1], strides = [1, 1]} : vector<16x16xf32> to vector<16x1xf32>
    %100 = vector.extract_strided_slice %95 {offsets = [0, 0], sizes = [16, 15], strides = [1, 1]} : vector<16x16xf32> to vector<16x15xf32>
    %101 = tpu.concatenate %99, %100 in 1 : vector<16x1xf32>, vector<16x15xf32> -> vector<16x16xf32>
    %cst_49 = arith.constant 0.000000e+00 : f32
    %102 = vector.broadcast %cst_49 : f32 to vector<16x16xf32>
    %103 = arith.subf %102, %98 : vector<16x16xf32>
    %104 = arith.select %4, %103, %101 : vector<16x16xi1>, vector<16x16xf32>
    %105 = arith.mulf %17, %95 : vector<16x16xf32>
    %cst_50 = arith.constant dense<0.000000e+00> : vector<16xf32>
    %106 = vector.multi_reduction <add>, %105, %cst_50 [1] : vector<16x16xf32> to vector<16xf32>
    %107 = vector.shape_cast %106 : vector<16xf32> to vector<16x1xf32>
    %108 = arith.mulf %107, %14 : vector<16x1xf32>
    %109 = arith.mulf %17, %104 : vector<16x16xf32>
    %cst_51 = arith.constant dense<0.000000e+00> : vector<16xf32>
    %110 = vector.multi_reduction <add>, %109, %cst_51 [1] : vector<16x16xf32> to vector<16xf32>
    %111 = vector.shape_cast %110 : vector<16xf32> to vector<16x1xf32>
    %112 = arith.mulf %111, %14 : vector<16x1xf32>
    %cst_52 = arith.constant 0.000000e+00 : f32
    %113 = vector.broadcast %cst_52 : f32 to vector<16x1xf32>
    %114 = arith.subf %113, %112 : vector<16x1xf32>
    %115 = arith.mulf %20, %95 : vector<16x16xf32>
    %cst_53 = arith.constant dense<0.000000e+00> : vector<16xf32>
    %116 = vector.multi_reduction <add>, %115, %cst_53 [1] : vector<16x16xf32> to vector<16xf32>
    %117 = vector.shape_cast %116 : vector<16xf32> to vector<16x1xf32>
    %118 = arith.mulf %117, %14 : vector<16x1xf32>
    %119 = arith.mulf %20, %104 : vector<16x16xf32>
    %cst_54 = arith.constant dense<0.000000e+00> : vector<16xf32>
    %120 = vector.multi_reduction <add>, %119, %cst_54 [1] : vector<16x16xf32> to vector<16xf32>
    %121 = vector.shape_cast %120 : vector<16xf32> to vector<16x1xf32>
    %122 = arith.mulf %121, %14 : vector<16x1xf32>
    %cst_55 = arith.constant 0.000000e+00 : f32
    %123 = vector.broadcast %cst_55 : f32 to vector<16x1xf32>
    %124 = arith.subf %123, %122 : vector<16x1xf32>
    %125 = arith.mulf %23, %95 : vector<16x16xf32>
    %cst_56 = arith.constant dense<0.000000e+00> : vector<16xf32>
    %126 = vector.multi_reduction <add>, %125, %cst_56 [1] : vector<16x16xf32> to vector<16xf32>
    %127 = vector.shape_cast %126 : vector<16xf32> to vector<16x1xf32>
    %128 = arith.mulf %127, %14 : vector<16x1xf32>
    %129 = arith.mulf %23, %104 : vector<16x16xf32>
    %cst_57 = arith.constant dense<0.000000e+00> : vector<16xf32>
    %130 = vector.multi_reduction <add>, %129, %cst_57 [1] : vector<16x16xf32> to vector<16xf32>
    %131 = vector.shape_cast %130 : vector<16xf32> to vector<16x1xf32>
    %132 = arith.mulf %131, %14 : vector<16x1xf32>
    %cst_58 = arith.constant 0.000000e+00 : f32
    %133 = vector.broadcast %cst_58 : f32 to vector<16x1xf32>
    %134 = arith.subf %133, %132 : vector<16x1xf32>
    %135 = arith.mulf %26, %95 : vector<16x16xf32>
    %cst_59 = arith.constant dense<0.000000e+00> : vector<16xf32>
    %136 = vector.multi_reduction <add>, %135, %cst_59 [1] : vector<16x16xf32> to vector<16xf32>
    %137 = vector.shape_cast %136 : vector<16xf32> to vector<16x1xf32>
    %138 = arith.mulf %137, %14 : vector<16x1xf32>
    %139 = tpu.concatenate %33, %48, %73, %108, %48, %58, %83, %118, %73, %83, %93, %128, %108, %118, %128, %138 in 1 : vector<16x1xf32>, vector<16x1xf32>, vector<16x1xf32>, vector<16x1xf32>, vector<16x1xf32>, vector<16x1xf32>, vector<16x1xf32>, vector<16x1xf32>, vector<16x1xf32>, vector<16x1xf32>, vector<16x1xf32>, vector<16x1xf32>, vector<16x1xf32>, vector<16x1xf32>, vector<16x1xf32>, vector<16x1xf32> -> vector<16x16xf32>
    %140 = tpu.concatenate %27, %52, %77, %112, %54, %27, %87, %122, %79, %89, %27, %132, %114, %124, %134, %27 in 1 : vector<16x1xf32>, vector<16x1xf32>, vector<16x1xf32>, vector<16x1xf32>, vector<16x1xf32>, vector<16x1xf32>, vector<16x1xf32>, vector<16x1xf32>, vector<16x1xf32>, vector<16x1xf32>, vector<16x1xf32>, vector<16x1xf32>, vector<16x1xf32>, vector<16x1xf32>, vector<16x1xf32>, vector<16x1xf32> -> vector<16x16xf32>
    %141 = tpu.concatenate %139, %140 in 1 : vector<16x16xf32>, vector<16x16xf32> -> vector<16x32xf32>
    %c0_60 = arith.constant 0 : index
    %c0_61 = arith.constant 0 : index
    %c0_62 = arith.constant 0 : index
    %142 = vector.load %arg4[%c0_60, %c0_61, %c0_62] : memref<1x16x32xf32, #tpu.memory_space<vmem>>, vector<1x16x32xf32>
    %143 = vector.shape_cast %142 : vector<1x16x32xf32> to vector<16x32xf32>
    %144 = vector.shape_cast %141 : vector<16x32xf32> to vector<1x16x32xf32>
    tpu.vector_store %arg4[%c0_60, %c0_61, %c0_62], %144 {strides = array<i32>} : memref<1x16x32xf32, #tpu.memory_space<vmem>>, vector<1x16x32xf32>,
    return
  }
  func.func @transform_0(%arg0: i32, %arg1: i32) -> (i32, i32, i32, i32) {
    %c0_i32 = arith.constant 0 : i32
    %c0_i32_0 = arith.constant 0 : i32
    %c0_i32_1 = arith.constant 0 : i32
    return %arg0, %c0_i32, %arg1, %c0_i32_0 : i32, i32, i32, i32
  }
  func.func @transform_1(%arg0: i32, %arg1: i32) -> (i32, i32, i32) {
    %c0_i32 = arith.constant 0 : i32
    %c0_i32_0 = arith.constant 0 : i32
    return %arg0, %arg1, %c0_i32 : i32, i32, i32
  }
  func.func @transform_2(%arg0: i32, %arg1: i32) -> (i32, i32, i32) {
    %c0_i32 = arith.constant 0 : i32
    %c0_i32_0 = arith.constant 0 : i32
    return %arg0, %arg1, %c0_i32 : i32, i32, i32
  }
}

</mosaic_0001>

<bundles_post_ra>
// kernel: tpu_custom_call.1
= control target key start
LH: loop header
LB: loop body
LE: loop exit
PB: predicated region body
PF: predicated region fallthrough
CT: control target
= control target key end

     0   :  { %7 = vsyncpa [#allocation3], 0  ;;  %s1570_s0 = inlined_call_operand.hbm [shape: f32[2,4,16,16], index: 0, kind: input, shape index: {}]   ;;  %s1571_s1 = inlined_call_operand.hbm [shape: f32[2,16,16], index: 1, kind: input, shape index: {}]   ;;  %s1572_s2 = inlined_call_operand.hbm [shape: f32[2,16,32], index: 2, kind: output, shape index: {}]  }
   0x1   :  { %9 = vsyncpa [#allocation3 + $0x1], 0 }
   0x2   :  { %10 = vsyncpa [#allocation6], 0 }
   0x3   :  { %12 = vsyncpa [#allocation6 + $0x1], 0 }
   0x4   :  { %13 = vsyncpa [#allocation4], 0 }
   0x5   :  { %15 = vsyncpa [#allocation4 + $0x1], 0  ;;  %s1041_s9 = smov 0   ;;  %s1043_s10 = smov 0  }
   0x6   :  { %s1045_s11 = smov 0   ;;  %s1047_s12 = smov 0  }
   0x7   :  { %s1049_s13 = smov 0   ;;  %s1051_s14 = smov 0  }
   0x8 LB: > { %s758_s15 = sadd.s32 4294967295, %s1012_s14   ;;  %s759_s16 = sadd.s32 4294967294, %s1012_s14   ;;  %s1012_s14 = sphi %s1051_s14, %s21_s14   ;;  %s1008_s13 = sphi %s1049_s13, %s1592_s13   ;;  %s1004_s12 = sphi %s1047_s12, %s1591_s12   ;;  %s1000_s11 = sphi %s1045_s11, %s1590_s11   ;;  %s996_s10 = sphi %s1043_s10, %s1589_s10   ;;  %s992_s9 = sphi %s1041_s9, %s1588_s9  }
   0x9   : > { %s33_s17 = sadd.s32 1, %s1008_s13  ;;  %s42_s18 = sadd.s32 1, %s1000_s11 }
   0xa   : > { %p35_p0 = scmp.ge.s32.totalorder %s33_s17, 2  ;;  %p49_p1 = scmp.ne.s32.totalorder %s1000_s11, %s996_s10 }
   0xb   : > { %p50_p2 = scmp.eq.s32.totalorder %s1012_s14, 0  ;;  %p55_p3 = scmp.ne.s32.totalorder %s996_s10, %s992_s9 }
   0xc   : > { %s1594_s17 = smov (%p35_p0, %s33_s17), 0  ;;  %p56_p5 = scmp.eq.s32.totalorder %s758_s15, 0 }
   0xd   : > { %p1082_p4 = por %p50_p2, %p49_p1  ;;  %s37_s20 = ssub.s32 %s1008_s13, %s1594_s17 }
   0xe   : > { %p109_p6 = scmp.eq.s32.totalorder %s758_s15, 1  ;;  %p40_p7 = scmp.eq.s32.totalorder %s37_s20, 0 }
   0xf   : > { %p1088_p8 = por %p56_p5, %p55_p3  ;;  %p115_p10 = scmp.eq.s32.totalorder %s759_s16, 1 }
  0x10   : > { %p1092_p9 = por %p109_p6, %p49_p1  ;;  %p803_p13 = scmp.lt.s32.totalorder %s1012_s14, 2 }
  0x11   : > { %s1576_s21 = scalar_select %p1088_p8, 1, 0 }
  0x12   : > { %s1577_s22 = scalar_select %p1092_p9, 1, 0 }
  0x13   : > { %s1097_s23 = scalar_select %p40_p7, %s1000_s11, %s42_s18  }
  0x14   : > { %p1099_p11 = por %p115_p10, %p55_p3  ;;  %s1106_s25 = sand.u32 1, %s1000_s11  }
  0x15   : > { %s762_s26 = sshll.u32 %s1106_s25, 6  ;;  %s783_s27 = sshll.u32 %s1008_s13, 10 }
  0x16   : > { %s1578_s24 = scalar_select %p1099_p11, 1, 0 }
  0x17   : > { %s1113_s30 = scalar_lea.hbm %s1570_s0, %s783_s27  ;;  %s139_s3 = scalar_lea.vmem [#allocation2], %s762_s26 }
  0x18   : > { %s148_s4 = sshll.u32 %s139_s3, 4  ;;  %p1119_p0 = pnand %p803_p13, %p1082_p4  ;;  %s1115_s4 = int_to_ptr.vmem [resolvable:$true] %s148_s4 }
  0x19   : > { %s136_s6 = scalar_lea.sflag [#allocation3], %s1106_s25  ;;  %s866_s7 = scalar_lea.hbm %s1113_s30, 1024 }
  0x1a   : > { %p867_p2 = scmp.ne.s32.totalorder %s1113_s30, %s866_s7  ;;  %p868_p3 = pneg %p1119_p0 }
  0x1b   : > { %s871_s16 = scalar_lea.hbm %s1570_s0, 2048  ;;  %p872_p4 = scmp.lt.u32.totalorder %s1113_s30, %s1570_s0 }
  0x1c   : > { %p869_p5 = pnand %p868_p3, %p867_p2  ;;  %p873_p7 = scmp.lt.u32.totalorder %s871_s16, %s866_s7 }
  0x1d   : > { %p875_p13 = scmp.lt.u32.totalorder %s866_s7, %s1113_s30 }
  0x1e   : > { %p870_p6 = pneg %p869_p5  ;;  %p874_p10 = por %p873_p7, %p872_p4 }
  0x20   : > { %p876_p12 = por %p875_p13, %p874_p10 }
  0x22   : > { %p877_p1 = pnand %p876_p12, %p870_p6 }
  0x24   : > { %880 = shalt.err (!%p877_p1)
}
  0x25   : > { %s881_s20 = scalar_lea.vmem %s1115_s4, 1024  ;;  %s1014_s26 = smov [#allocation2]  }
  0x26   : > { %p882_p2 = scmp.ne.s32.totalorder %s1115_s4, %s881_s20  ;;  %s886_s27 = sshll.u32 %s1014_s26, 4  ;;  %s887_s27 = int_to_ptr.vmem [resolvable:$false] %s886_s27 }
  0x27   : > { %s888_s28 = scalar_lea.vmem %s887_s27, 2048  ;;  %p889_p9 = scmp.lt.s32.totalorder %s1115_s4, %s887_s27 }
  0x28   : > { %p884_p5 = pnand %p882_p2, %p868_p3  ;;  %p890_p4 = scmp.lt.s32.totalorder %s888_s28, %s881_s20 }
  0x2a   : > { %p885_p11 = pneg %p884_p5  ;;  %p891_p7 = por %p890_p4, %p889_p9 }
  0x2c   : > { %p892_p10 = pnand %p891_p7, %p885_p11 }
  0x2e   : > { %895 = shalt.err (!%p892_p10)
}
  0x2f   : > { %s1015_s29 = smov 128   ;;  %s1016_s3 = smov 8  }
  0x30   : > { %795 = dma.hbm_to_vmem [thread:$0]  (!%p1119_p0), %s1113_s30, 1024, %s1115_s4, %s136_s6, %s1015_s29, %s1015_s29, %s1016_s3  }
  0x31   : > { %p179_p9 = scmp.lt.s32.totalorder %s1012_s14, 3  ;;  %s765_s7 = sshll.u32 %s1106_s25, 4 }
  0x32   : > { %s784_s8 = sshll.u32 %s1008_s13, 8  ;;  %p1580_p11 = scmp.ge.s32.totalorder %s1012_s14, 1 }
  0x33   : > { %s1167_s19 = scalar_lea.hbm %s1571_s1, %s784_s8  ;;  %s162_s20 = scalar_lea.vmem [#allocation5], %s765_s7 }
  0x34   : > { %p1160_p12 = pnand %p1580_p11, %p179_p9  ;;  %s171_s26 = sshll.u32 %s162_s20, 4  ;;  %s1169_s26 = int_to_ptr.vmem [resolvable:$true] %s171_s26 }
  0x35   : > { %s159_s30 = scalar_lea.sflag [#allocation6], %s1106_s25  ;;  %s896_s4 = scalar_lea.hbm %s1167_s19, 256 }
  0x36   : > { %p897_p1 = scmp.ne.s32.totalorder %s1167_s19, %s896_s4  ;;  %s901_s28 = scalar_lea.hbm %s1571_s1, 512 }
  0x37   : > { %p902_p2 = scmp.lt.u32.totalorder %s1167_s19, %s1571_s1  ;;  %p903_p5 = scmp.lt.u32.totalorder %s901_s28, %s896_s4 }
  0x38   : > { %p899_p6 = pnand %p897_p1, %p868_p3  ;;  %p905_p7 = scmp.lt.u32.totalorder %s896_s4, %s1167_s19 }
  0x39   : > { %p904_p4 = por %p903_p5, %p902_p2 }
  0x3a   : > { %p900_p13 = pneg %p899_p6 }
  0x3b   : > { %p906_p10 = por %p905_p7, %p904_p4 }
  0x3d   : > { %p907_p9 = pnand %p906_p10, %p900_p13 }
  0x3f   : > { %910 = shalt.err (!%p907_p9)
}
  0x40   : > { %s911_s7 = scalar_lea.vmem %s1169_s26, 256  ;;  %s1017_s18 = smov [#allocation5]  }
  0x41   : > { %p912_p11 = scmp.ne.s32.totalorder %s1169_s26, %s911_s7  ;;  %s916_s20 = sshll.u32 %s1017_s18, 4  ;;  %s917_s20 = int_to_ptr.vmem [resolvable:$false] %s916_s20 }
  0x42   : > { %s918_s6 = scalar_lea.vmem %s917_s20, 512  ;;  %p919_p8 = scmp.lt.s32.totalorder %s1169_s26, %s917_s20 }
  0x43   : > { %p914_p1 = pnand %p912_p11, %p868_p3  ;;  %p920_p2 = scmp.lt.s32.totalorder %s918_s6, %s911_s7 }
  0x45   : > { %p915_p6 = pneg %p914_p1  ;;  %p921_p5 = por %p920_p2, %p919_p8 }
  0x47   : > { %p922_p4 = pnand %p921_p5, %p915_p6 }
  0x49   : > { %925 = shalt.err (!%p922_p4)
}
  0x4a   : > { %798 = dma.hbm_to_vmem [thread:$0]  (!%p1119_p0), %s1167_s19, 256, %s1169_s26, %s159_s30, %s1015_s29, %s1015_s29, %s1016_s3  }
  0x4b   : > { %183 = sbr.rel (%p1160_p12) target bundleno = 543 (0x21f), region = 28  ;;  %s1203_s4 = sand.u32 (!%p1160_p12), 1, %s996_s10  }
  0x4c   : > { %s769_s27 = sshll.u32 (!%p1160_p12), %s1203_s4, 6  ;;  %s186_s28 = scalar_lea.sflag (!%p1160_p12), [#allocation3], %s1203_s4 }
  0x4d   : > { %s1207_s5 = scalar_lea.vmem (!%p1160_p12), [#allocation2], %s769_s27  ;;  %p1582_p8 = scmp.ne.s32.totalorder (!%p1160_p12), %s1576_s21, 0 }
  0x52   : > { %979 = dma.done.wait (%p1582_p8), %s186_s28, 1024  }
  0x53   : > { %981 = vsyncadd (%p1582_p8), %s186_s28, 4294966272  ;;  %s770_s25 = sshll.u32 %s1203_s4, 4  ;;  %s195_s29 = scalar_lea.sflag [#allocation6], %s1203_s4 }
  0x54   : > { %s1217_s3 = scalar_lea.vmem [#allocation5], %s770_s25 }
  0x55   : > { %983 = dma.done.wait (%p1582_p8), %s195_s29, 256  }
  0x56   : > { %985 = vsyncadd (%p1582_p8), %s195_s29, 4294967040  ;;  %v1224_v0 = vld [vmem:[%s1207_s5 + $0x10] sm:$0xff]  ;;  %s1018_s15 = smov 15   ;;  %s1019_s19 = smov 127   ;;  %v1229_v1 = vld [vmem:[%s1207_s5 + $0x18] sm:$0xff]  ;;  %vm233_vm0 = vcmask 130048   ;;  %v227_v18 = vlaneseq }
  0x57   : > { %285 = vrot.lane.b32.xlu1 %v1224_v0, %s1018_s15  ;;  %279 = vrot.lane.b32.xlu0 %v1224_v0, %s1019_s19  ;;  %v1234_v2 = vld [vmem:[%s1207_s5 + $0x28] sm:$0xff]  ;;  %v1237_v3 = vld [vmem:[%s1207_s5 + $0x20] sm:$0xff]  ;;  %s1020_s21 = smov 113   ;;  %s1021_s26 = smov 1   ;;  %vm291_vm1 = vcmask 121856   ;;  %vm306_vm2 = vcmask 7168  }
  0x58   : > { %v1248_v4 = vld [vmem:[%s1207_s5 + $0x38] sm:$0xff]  ;;  %v1251_v5 = vld [vmem:[%s1207_s5 + $0x30] sm:$0xff]  ;;  %v228_v21 = vand.u32 127, %v227_v18  ;;  %v1292_v25 = vld [vmem:[%s1207_s5] sm:$0xff]  ;;  %vm545_vm4 = vcmask 15360   ;;  %vm548_vm5 = vcmask 23552  }
  0x59   : > { %v1266_v6 = vld [vmem:[%s1217_s3] sm:$0xff]  ;;  %v1273_v8 = vld [vmem:[%s1217_s3 + $0x8] sm:$0xff]  ;;  %vm551_vm6 = vcmask 31744   ;;  %vm554_vm7 = vcmask 39936   ;;  %vm557_vm8 = vcmask 48128   ;;  %vm560_vm9 = vcmask 56320  }
  0x5a   : > { %v1270_v7 = vmul.f32 %v1224_v0, %v1266_v6  ;;  %v234_v9 = vsel %vm233_vm0, %v1266_v6, 0.0  ;;  %v1279_v10 = vmul.f32 %v1229_v1, %v1273_v8  ;;  %v237_v13 = vsel %vm233_vm0, %v1273_v8, 0.0  ;;  %v1297_v30 = vld [vmem:[%s1207_s5 + $0x8] sm:$0xff]  ;;  %s1022_s30 = smov 16   ;;  %s223_s8 = scalar_lea.vmem [#allocation7], %s770_s25 }
  0x5b   : > { %287 = vrot.lane.b32.xlu1 %v1229_v1, %s1018_s15  ;;  %281 = vrot.lane.b32.xlu0 %v1229_v1, %s1019_s19  ;;  %v229_v24 = vand.u32 1, %v228_v21  ;;  %v1301_v31 = vmul.f32 %v1292_v25, %v1266_v6  ;;  %v1309_v37 = vmul.f32 %v1297_v30, %v1273_v8  ;;  %v261_v32 = vmul.f32 %v1234_v2, %v1273_v8  ;;  %s645_s16 = sshll.u32 %s223_s8, 4  ;;  %s785_s7 = sshll.u32 %s1004_s12, 8  ;;  %s1512_s16 = int_to_ptr.vmem [resolvable:$true] %s645_s16 }
  0x5c   : > { %v1283_v11 = vmul.f32 %v1251_v5, %v1270_v7  ;;  %v1287_v12 = vmul.f32 %v1248_v4, %v1279_v10  ;;  %vm563_vm10 = vcmask 64512   ;;  %vm566_vm11 = vcmask 72704   ;;  %s1517_s6 = scalar_lea.hbm %s1572_s2, %s785_s7  ;;  %s630_s12 = scalar_lea.sflag [#allocation4], %s1203_s4 }
  0x5d   : > { %vm1303_vm3 = vcmp.eq.s32.totalorder %v229_v24, 0  ;;  %vm569_vm12 = vcmask 80896   ;;  %vm572_vm13 = vcmask 89088   ;;  %vm575_vm14 = vcmask 97280   ;;  %s926_s27 = scalar_lea.vmem %s1512_s16, 256  ;;  %p1585_p3 = scmp.ne.s32.totalorder %s1577_s22, 0 }
  0x5e   : > { %vm578_vm15 = vcmask 105472   ;;  %p927_p0 = scmp.ne.s32.totalorder %s1512_s16, %s926_s27  ;;  %s1023_s28 = smov [#allocation7]  }
  0x5f   : > { %349 = vrot.lane.b32.xlu1 %v1234_v2, %s1019_s19  ;;  %347 = vrot.lane.b32.xlu0 %v1237_v3, %s1019_s19  ;;  %s930_s5 = sshll.u32 %s1023_s28, 4  ;;  %s931_s5 = int_to_ptr.vmem [resolvable:$false] %s930_s5 }
  0x60   : > { %p928_p12 = pnand %p927_p0, %p1585_p3  ;;  %s932_s25 = scalar_lea.vmem %s931_s5, 512 }
  0x61   : > { %p933_p7 = scmp.lt.s32.totalorder %s1512_s16, %s931_s5  ;;  %p934_p10 = scmp.lt.s32.totalorder %s932_s25, %s926_s27 }
  0x62   : > { %p929_p13 = pneg %p928_p12 }
  0x63   : > { %355 = vrot.lane.b32.xlu1 %v1234_v2, %s1018_s15  ;;  %353 = vrot.lane.b32.xlu0 %v1237_v3, %s1018_s15  ;;  %p935_p9 = por %p934_p10, %p933_p7 }
  0x65   : > { %p936_p11 = pnand %p935_p9, %p929_p13 }
  0x67   : > { %296 = vrot.lane.b32.xlu1 %v1229_v1, %s1020_s21  ;;  %294 = vrot.lane.b32.xlu0 %v1224_v0, %s1020_s21 }
  0x6b   : > { %302 = vrot.lane.b32.xlu1 %v1229_v1, %s1021_s26  ;;  %300 = vrot.lane.b32.xlu0 %v1224_v0, %s1021_s26 }
  0x6f   : > { %437 = vrot.lane.b32.xlu1 %v1248_v4, %s1019_s19  ;;  %435 = vrot.lane.b32.xlu0 %v1251_v5, %s1019_s19 }
  0x73   : > { %443 = vrot.lane.b32.xlu1 %v1248_v4, %s1018_s15  ;;  %441 = vrot.lane.b32.xlu0 %v1251_v5, %s1018_s15 }
  0x77   : > { %363 = vrot.lane.b32.xlu1 %v1234_v2, %s1020_s21  ;;  %361 = vrot.lane.b32.xlu0 %v1237_v3, %s1020_s21 }
  0x7b   : > { %369 = vrot.lane.b32.xlu1 %v1234_v2, %s1021_s26  ;;  %367 = vrot.lane.b32.xlu0 %v1237_v3, %s1021_s26 }
  0x7f   : > { %451 = vrot.lane.b32.xlu1 %v1248_v4, %s1020_s21  ;;  %449 = vrot.lane.b32.xlu0 %v1251_v5, %s1020_s21 }
  0x83   : > { %457 = vrot.lane.b32.xlu1 %v1248_v4, %s1021_s26  ;;  %455 = vrot.lane.b32.xlu0 %v1251_v5, %s1021_s26 }
  0xa2   : > { %235 = vadd.xlane.f32.xlu0 %v234_v9 }
  0xa7   : > { %238 = vadd.xlane.f32.xlu1 %v237_v13 }
  0xc9   : > { %v286_v14 = vpop.permute.xlu1 %285  ;;  %v280_v15 = vpop.permute.xlu0 %279 }
  0xca   : > { %v292_v28 = vsel %vm291_vm1, %v280_v15, %v286_v14 }
  0xcb   : > { %v309_v33 = vsub.f32 0.0, %v292_v28 }
  0xcd   : > { %v288_v16 = vpop.permute.xlu1 %287  ;;  %v282_v17 = vpop.permute.xlu0 %281 }
  0xce   : > { %v293_v29 = vsel %vm291_vm1, %v282_v17, %v288_v16 }
  0xcf   : > { %v310_v34 = vsub.f32 0.0, %v293_v29 }
  0xd1   : > { %v350_v19 = vpop.permute.xlu1 %349  ;;  %v348_v20 = vpop.permute.xlu0 %347 }
  0xd5   : > { %v356_v22 = vpop.permute.xlu1 %355  ;;  %v354_v23 = vpop.permute.xlu0 %353 }
  0xd6   : > { %v360_v52 = vsel %vm291_vm1, %v350_v19, %v356_v22  ;;  %v359_v53 = vsel %vm291_vm1, %v348_v20, %v354_v23 }
  0xd7   : > { %v376_v54 = vsub.f32 0.0, %v360_v52  ;;  %v375_v55 = vsub.f32 0.0, %v359_v53  ;;  %v313_v52 = vmul.f32 %v1224_v0, %v1301_v31  ;;  %v314_v53 = vmul.f32 %v1229_v1, %v1309_v37 }
  0xd9   : > { %v297_v26 = vpop.permute.xlu1 %296  ;;  %v295_v27 = vpop.permute.xlu0 %294 }
  0xdd   : > { %v303_v35 = vpop.permute.xlu1 %302  ;;  %v301_v36 = vpop.permute.xlu0 %300 }
  0xde   : > { %v308_v38 = vsel %vm306_vm2, %v297_v26, %v303_v35  ;;  %v307_v39 = vsel %vm306_vm2, %v295_v27, %v301_v36  ;;  %v260_v36 = vmul.f32 %v1237_v3, %v1266_v6 }
  0xdf   : > { %v311_v40 = vsel %vm1303_vm3, %v309_v33, %v307_v39  ;;  %v312_v41 = vsel %vm1303_vm3, %v310_v34, %v308_v38 }
  0xe0   : > { %v323_v42 = vmul.f32 %v311_v40, %v1301_v31  ;;  %v324_v46 = vmul.f32 %v312_v41, %v1309_v37 }
  0xe1   : > { %v438_v43 = vpop.permute.xlu1 %437  ;;  %v436_v44 = vpop.permute.xlu0 %435 }
  0xe2   : > { %v325_v45 = vsel %vm233_vm0, %v323_v42, 0.0  ;;  %v328_v49 = vsel %vm233_vm0, %v324_v46, 0.0  ;;  %v267_v46 = vmul.f32 %v1301_v31, %v1292_v25  ;;  %v315_v25 = vsel %vm233_vm0, %v313_v52, 0.0 }
  0xe3   : > { %326 = vadd.xlane.f32.xlu0 %v325_v45 }
  0xe5   : > { %v444_v47 = vpop.permute.xlu1 %443  ;;  %v442_v48 = vpop.permute.xlu0 %441 }
  0xe6   : > { %v448_v14 = vsel %vm291_vm1, %v438_v43, %v444_v47  ;;  %v447_v15 = vsel %vm291_vm1, %v436_v44, %v442_v48  ;;  %v268_v47 = vmul.f32 %v1309_v37, %v1297_v30  ;;  %v318_v30 = vsel %vm233_vm0, %v314_v53, 0.0 }
  0xe7   : > { %329 = vadd.xlane.f32.xlu0 %v328_v49  ;;  %v464_v18 = vsub.f32 0.0, %v448_v14  ;;  %v463_v19 = vsub.f32 0.0, %v447_v15  ;;  %v424_v15 = vmul.f32 %v1234_v2, %v261_v32 }
  0xe9   : > { %v364_v50 = vpop.permute.xlu1 %363  ;;  %v362_v51 = vpop.permute.xlu0 %361 }
  0xed   : > { %v370_v56 = vpop.permute.xlu1 %369  ;;  %v368_v57 = vpop.permute.xlu0 %367 }
  0xee   : > { %v374_v58 = vsel %vm306_vm2, %v364_v50, %v370_v56  ;;  %v373_v59 = vsel %vm306_vm2, %v362_v51, %v368_v57  ;;  %v269_v50 = vsel %vm233_vm0, %v267_v46, 0.0  ;;  %v272_v51 = vsel %vm233_vm0, %v268_v47, 0.0 }
  0xef   : > { %v377_v60 = vsel %vm1303_vm3, %v375_v55, %v373_v59  ;;  %v378_v61 = vsel %vm1303_vm3, %v376_v54, %v374_v58  ;;  %v335_v54 = vmul.f32 %v1224_v0, %v1270_v7  ;;  %v336_v55 = vmul.f32 %v1229_v1, %v1279_v10 }
  0xf0   : > { %v389_v62 = vmul.f32 %v377_v60, %v1301_v31  ;;  %v390_v63 = vmul.f32 %v378_v61, %v1309_v37  ;;  %v411_v34 = vmul.f32 %v377_v60, %v1270_v7  ;;  %v412_v35 = vmul.f32 %v378_v61, %v1279_v10 }
  0xf1   : > { %v452_v9 = vpop.permute.xlu1 %451  ;;  %v450_v13 = vpop.permute.xlu0 %449  ;;  %v337_v56 = vsel %vm233_vm0, %v335_v54, 0.0  ;;  %v340_v57 = vsel %vm233_vm0, %v336_v55, 0.0  ;;  %v379_v58 = vmul.f32 %v1237_v3, %v1301_v31  ;;  %v380_v59 = vmul.f32 %v1234_v2, %v1309_v37 }
  0xf2   : > { %v391_v16 = vsel %vm233_vm0, %v389_v62, 0.0  ;;  %v394_v17 = vsel %vm233_vm0, %v390_v63, 0.0  ;;  %v413_v38 = vsel %vm233_vm0, %v411_v34, 0.0  ;;  %v416_v39 = vsel %vm233_vm0, %v412_v35, 0.0 }
  0xf3   : > { %392 = vadd.xlane.f32.xlu1 %v391_v16  ;;  %395 = vadd.xlane.f32.xlu0 %v394_v17  ;;  %v381_v60 = vsel %vm233_vm0, %v379_v58, 0.0  ;;  %v384_v0 = vsel %vm233_vm0, %v380_v59, 0.0  ;;  %v401_v1 = vmul.f32 %v1237_v3, %v1270_v7  ;;  %v402_v61 = vmul.f32 %v1234_v2, %v1279_v10 }
  0xf4   : > { %v491_v16 = vsel %vm233_vm0, %v1283_v11, 0.0  ;;  %v428_v17 = vsel %vm233_vm0, %v424_v15, 0.0  ;;  %v266_v2 = vmul.f32 %v1248_v4, %v1273_v8 }
  0xf5   : > { %v458_v20 = vpop.permute.xlu1 %457  ;;  %v456_v21 = vpop.permute.xlu0 %455  ;;  %v403_v62 = vsel %vm233_vm0, %v401_v1, 0.0  ;;  %v406_v63 = vsel %vm233_vm0, %v402_v61, 0.0 }
  0xf6   : > { %v462_v22 = vsel %vm306_vm2, %v452_v9, %v458_v20  ;;  %v461_v23 = vsel %vm306_vm2, %v450_v13, %v456_v21  ;;  %v467_v9 = vmul.f32 %v1251_v5, %v1301_v31  ;;  %v468_v13 = vmul.f32 %v1248_v4, %v1309_v37 }
  0xf7   : > { %v466_v24 = vsel %vm1303_vm3, %v464_v18, %v462_v22  ;;  %v465_v26 = vsel %vm1303_vm3, %v463_v19, %v461_v23  ;;  %v511_v18 = vmul.f32 %v1251_v5, %v260_v36  ;;  %v512_v19 = vmul.f32 %v1248_v4, %v261_v32 }
  0xf8   : > { %v477_v27 = vmul.f32 %v465_v26, %v1301_v31  ;;  %v478_v28 = vmul.f32 %v466_v24, %v1309_v37  ;;  %v499_v40 = vmul.f32 %v465_v26, %v1270_v7  ;;  %v500_v41 = vmul.f32 %v466_v24, %v1279_v10 }
  0xf9   : > { %v521_v44 = vmul.f32 %v465_v26, %v260_v36  ;;  %v522_v45 = vmul.f32 %v466_v24, %v261_v32  ;;  %v469_v14 = vsel %vm233_vm0, %v467_v9, 0.0  ;;  %v472_v7 = vsel %vm233_vm0, %v468_v13, 0.0 }
  0xfa   : > { %v479_v29 = vsel %vm233_vm0, %v477_v27, 0.0  ;;  %v482_v33 = vsel %vm233_vm0, %v478_v28, 0.0  ;;  %v501_v42 = vsel %vm233_vm0, %v499_v40, 0.0  ;;  %v504_v43 = vsel %vm233_vm0, %v500_v41, 0.0 }
  0xfb   : > { %480 = vadd.xlane.f32.xlu1 %v479_v29  ;;  %483 = vadd.xlane.f32.xlu0 %v482_v33  ;;  %v523_v48 = vsel %vm233_vm0, %v521_v44, 0.0  ;;  %v526_v49 = vsel %vm233_vm0, %v522_v45, 0.0  ;;  %v423_v10 = vmul.f32 %v1237_v3, %v260_v36  ;;  %v494_v31 = vsel %vm233_vm0, %v1287_v12, 0.0 }
  0xfc   : > { %v265_v3 = vmul.f32 %v1251_v5, %v1266_v6  ;;  %v513_v11 = vsel %vm233_vm0, %v511_v18, 0.0  ;;  %v516_v12 = vsel %vm233_vm0, %v512_v19, 0.0  ;;  %v534_v21 = vmul.f32 %v1248_v4, %v266_v2 }
  0xfd   : > { %v425_v37 = vsel %vm233_vm0, %v423_v10, 0.0  ;;  %vm581_vm3 = vcmask 113664  }
  0xfe   : > { %v533_v20 = vmul.f32 %v1251_v5, %v265_v3  ;;  %v538_v23 = vsel %vm233_vm0, %v534_v21, 0.0 }
  0xff   : > { %414 = vadd.xlane.f32.xlu1 %v413_v38  ;;  %417 = vadd.xlane.f32.xlu0 %v416_v39 }
 0x100   : > { %v535_v22 = vsel %vm233_vm0, %v533_v20, 0.0 }
 0x103   : > { %502 = vadd.xlane.f32.xlu1 %v501_v42  ;;  %505 = vadd.xlane.f32.xlu0 %v504_v43 }
 0x107   : > { %524 = vadd.xlane.f32.xlu1 %v523_v48  ;;  %527 = vadd.xlane.f32.xlu0 %v526_v49 }
 0x10b   : > { %270 = vadd.xlane.f32.xlu1 %v269_v50  ;;  %273 = vadd.xlane.f32.xlu0 %v272_v51 }
 0x10f   : > { %316 = vadd.xlane.f32.xlu1 %v315_v25  ;;  %319 = vadd.xlane.f32.xlu0 %v318_v30 }
 0x113   : > { %338 = vadd.xlane.f32.xlu1 %v337_v56  ;;  %341 = vadd.xlane.f32.xlu0 %v340_v57 }
 0x117   : > { %382 = vadd.xlane.f32.xlu1 %v381_v60  ;;  %385 = vadd.xlane.f32.xlu0 %v384_v0 }
 0x11b   : > { %404 = vadd.xlane.f32.xlu1 %v403_v62  ;;  %407 = vadd.xlane.f32.xlu0 %v406_v63 }
 0x11f   : > { %470 = vadd.xlane.f32.xlu1 %v469_v14  ;;  %473 = vadd.xlane.f32.xlu0 %v472_v7 }
 0x123   : > { %492 = vadd.xlane.f32.xlu1 %v491_v16  ;;  %495 = vadd.xlane.f32.xlu0 %v494_v31 }
 0x127   : > { %426 = vadd.xlane.f32.xlu1 %v425_v37  ;;  %429 = vadd.xlane.f32.xlu0 %v428_v17 }
 0x12b   : > { %514 = vadd.xlane.f32.xlu1 %v513_v11  ;;  %517 = vadd.xlane.f32.xlu0 %v516_v12 }
 0x12f   : > { %536 = vadd.xlane.f32.xlu1 %v535_v22  ;;  %539 = vadd.xlane.f32.xlu0 %v538_v23  ;;  %v236_v6 = vpop.xlane.xlu0 %235 }
 0x130   : > { %v240_v24 = vmul.f32 0.5, %v236_v6 }
 0x132   : > { %v242_v27 = vadd.f32 1e-15, %v240_v24 }
 0x134   : > { %v239_v8 = vpop.xlane.xlu1 %238  ;;  %862 = vrcp.f32 %v242_v27 }
 0x135   : > { %v241_v26 = vmul.f32 0.5, %v239_v8 }
 0x137   : > { %v243_v28 = vadd.f32 1e-15, %v241_v26 }
 0x139   : > { %864 = vrcp.f32 %v243_v28 }
 0x13e   : > { %v1415_v33 = vpop.eup %862 }
 0x143   : > { %v1417_v4 = vpop.eup %864 }
 0x170   : > { %v327_v29 = vpop.xlane.xlu0 %326 }
 0x171   : > { %v331_v36 = vmul.f32 %v1415_v33, %v327_v29 }
 0x173   : > { %v586_v42 = vsel %vm306_vm2, 0.0, %v331_v36  ;;  %v333_v46 = vsub.f32 0.0, %v331_v36 }
 0x174   : > { %v330_v5 = vpop.xlane.xlu0 %329 }
 0x175   : > { %v332_v32 = vmul.f32 %v1417_v4, %v330_v5 }
 0x177   : > { %v587_v43 = vsel %vm306_vm2, 0.0, %v332_v32  ;;  %v334_v47 = vsub.f32 0.0, %v332_v32 }
 0x180   : > { %v393_v34 = vpop.xlane.xlu1 %392  ;;  %v396_v35 = vpop.xlane.xlu0 %395 }
 0x181   : > { %v397_v38 = vmul.f32 %v1415_v33, %v393_v34  ;;  %v398_v39 = vmul.f32 %v1417_v4, %v396_v35 }
 0x183   : > { %v588_v48 = vsel %vm545_vm4, %v586_v42, %v397_v38  ;;  %v589_v49 = vsel %vm545_vm4, %v587_v43, %v398_v39  ;;  %v399_v1 = vsub.f32 0.0, %v397_v38  ;;  %v400_v61 = vsub.f32 0.0, %v398_v39 }
 0x188   : > { %v481_v40 = vpop.xlane.xlu1 %480  ;;  %v484_v41 = vpop.xlane.xlu0 %483 }
 0x189   : > { %v485_v44 = vmul.f32 %v1415_v33, %v481_v40  ;;  %v486_v45 = vmul.f32 %v1417_v4, %v484_v41 }
 0x18b   : > { %v590_v50 = vsel %vm548_vm5, %v588_v48, %v485_v44  ;;  %v591_v51 = vsel %vm548_vm5, %v589_v49, %v486_v45  ;;  %v487_v10 = vsub.f32 0.0, %v485_v44  ;;  %v488_v15 = vsub.f32 0.0, %v486_v45 }
 0x18c   : > { %v592_v52 = vsel %vm551_vm6, %v590_v50, %v333_v46  ;;  %v593_v53 = vsel %vm551_vm6, %v591_v51, %v334_v47  ;;  %v415_v25 = vpop.xlane.xlu1 %414  ;;  %v418_v30 = vpop.xlane.xlu0 %417 }
 0x18d   : > { %v419_v54 = vmul.f32 %v1415_v33, %v415_v25  ;;  %v420_v55 = vmul.f32 %v1417_v4, %v418_v30  ;;  %v594_v56 = vsel %vm554_vm7, %v592_v52, 0.0  ;;  %v595_v57 = vsel %vm554_vm7, %v593_v53, 0.0 }
 0x18f   : > { %v596_v62 = vsel %vm557_vm8, %v594_v56, %v419_v54  ;;  %v597_v63 = vsel %vm557_vm8, %v595_v57, %v420_v55  ;;  %v421_v9 = vsub.f32 0.0, %v419_v54  ;;  %v422_v13 = vsub.f32 0.0, %v420_v55 }
 0x190   : > { %v503_v58 = vpop.xlane.xlu1 %502  ;;  %v506_v59 = vpop.xlane.xlu0 %505 }
 0x191   : > { %v507_v60 = vmul.f32 %v1415_v33, %v503_v58  ;;  %v508_v0 = vmul.f32 %v1417_v4, %v506_v59 }
 0x193   : > { %v598_v14 = vsel %vm560_vm9, %v596_v62, %v507_v60  ;;  %v599_v7 = vsel %vm560_vm9, %v597_v63, %v508_v0  ;;  %v509_v11 = vsub.f32 0.0, %v507_v60  ;;  %v510_v12 = vsub.f32 0.0, %v508_v0 }
 0x194   : > { %v600_v16 = vsel %vm563_vm10, %v598_v14, %v399_v1  ;;  %v601_v31 = vsel %vm563_vm10, %v599_v7, %v400_v61  ;;  %v525_v37 = vpop.xlane.xlu1 %524  ;;  %v528_v17 = vpop.xlane.xlu0 %527 }
 0x195   : > { %v529_v18 = vmul.f32 %v1415_v33, %v525_v37  ;;  %v602_v19 = vsel %vm566_vm11, %v600_v16, %v421_v9  ;;  %v603_v3 = vsel %vm566_vm11, %v601_v31, %v422_v13  ;;  %v530_v2 = vmul.f32 %v1417_v4, %v528_v17 }
 0x196   : > { %v604_v20 = vsel %vm569_vm12, %v602_v19, 0.0  ;;  %v605_v21 = vsel %vm569_vm12, %v603_v3, 0.0 }
 0x197   : > { %v531_v22 = vsub.f32 0.0, %v529_v18  ;;  %v606_v23 = vsel %vm572_vm13, %v604_v20, %v529_v18  ;;  %v532_v6 = vsub.f32 0.0, %v530_v2  ;;  %v607_v8 = vsel %vm572_vm13, %v605_v21, %v530_v2 }
 0x198   : > { %v271_v24 = vpop.xlane.xlu1 %270  ;;  %v274_v26 = vpop.xlane.xlu0 %273  ;;  %v608_v27 = vsel %vm575_vm14, %v606_v23, %v487_v10  ;;  %v609_v28 = vsel %vm575_vm14, %v607_v8, %v488_v15 }
 0x199   : > { %v610_v29 = vsel %vm578_vm15, %v608_v27, %v509_v11  ;;  %v611_v5 = vsel %vm578_vm15, %v609_v28, %v510_v12  ;;  %v275_v50 = vmul.f32 %v1415_v33, %v271_v24  ;;  %v276_v51 = vmul.f32 %v1417_v4, %v274_v26 }
 0x19a   : > { %v612_v34 = vsel %vm581_vm3, %v610_v29, %v531_v22  ;;  %v613_v35 = vsel %vm581_vm3, %v611_v5, %v532_v6 }
 0x19b   : > { %v614_v36 = vsel %vm291_vm1, %v612_v34, 0.0  ;;  %v615_v32 = vsel %vm291_vm1, %v613_v35, 0.0 }
 0x19c   : > { %v317_v38 = vpop.xlane.xlu1 %316  ;;  %618 = vrot.lane.b32.xlu1 %v614_v36, %s1022_s30  ;;  %620 = vrot.lane.b32.xlu0 %v615_v32, %s1022_s30  ;;  %v320_v39 = vpop.xlane.xlu0 %319 }
 0x19d   : > { %v321_v46 = vmul.f32 %v1415_v33, %v317_v38  ;;  %v322_v47 = vmul.f32 %v1417_v4, %v320_v39 }
 0x19f   : > { %v543_v25 = vsel %vm306_vm2, %v275_v50, %v321_v46  ;;  %v544_v30 = vsel %vm306_vm2, %v276_v51, %v322_v47  ;;  %vm626_vm2 = vcmask 261120  }
 0x1a0   : > { %v339_v40 = vpop.xlane.xlu1 %338  ;;  %v342_v41 = vpop.xlane.xlu0 %341 }
 0x1a1   : > { %v343_v58 = vmul.f32 %v1415_v33, %v339_v40  ;;  %v344_v59 = vmul.f32 %v1417_v4, %v342_v41 }
 0x1a4   : > { %v383_v42 = vpop.xlane.xlu1 %382  ;;  %v386_v43 = vpop.xlane.xlu0 %385 }
 0x1a5   : > { %v387_v48 = vmul.f32 %v1415_v33, %v383_v42  ;;  %v388_v49 = vmul.f32 %v1417_v4, %v386_v43 }
 0x1a7   : > { %v546_v56 = vsel %vm545_vm4, %v543_v25, %v387_v48  ;;  %v547_v57 = vsel %vm545_vm4, %v544_v30, %v388_v49 }
 0x1a8   : > { %v405_v44 = vpop.xlane.xlu1 %404  ;;  %v408_v45 = vpop.xlane.xlu0 %407 }
 0x1a9   : > { %v409_v1 = vmul.f32 %v1415_v33, %v405_v44  ;;  %v410_v61 = vmul.f32 %v1417_v4, %v408_v45 }
 0x1ac   : > { %v471_v52 = vpop.xlane.xlu1 %470  ;;  %v474_v53 = vpop.xlane.xlu0 %473 }
 0x1ad   : > { %v475_v54 = vmul.f32 %v1415_v33, %v471_v52  ;;  %v476_v55 = vmul.f32 %v1417_v4, %v474_v53 }
 0x1af   : > { %v549_v60 = vsel %vm548_vm5, %v546_v56, %v475_v54  ;;  %v550_v0 = vsel %vm548_vm5, %v547_v57, %v476_v55 }
 0x1b0   : > { %v552_v62 = vsel %vm551_vm6, %v549_v60, %v321_v46  ;;  %v553_v63 = vsel %vm551_vm6, %v550_v0, %v322_v47  ;;  %v493_v9 = vpop.xlane.xlu1 %492  ;;  %v496_v13 = vpop.xlane.xlu0 %495 }
 0x1b1   : > { %v497_v14 = vmul.f32 %v1415_v33, %v493_v9  ;;  %v555_v7 = vsel %vm554_vm7, %v552_v62, %v343_v58  ;;  %v556_v10 = vsel %vm554_vm7, %v553_v63, %v344_v59  ;;  %v498_v15 = vmul.f32 %v1417_v4, %v496_v13 }
 0x1b2   : > { %v558_v16 = vsel %vm557_vm8, %v555_v7, %v409_v1  ;;  %v559_v31 = vsel %vm557_vm8, %v556_v10, %v410_v61 }
 0x1b3   : > { %v561_v37 = vsel %vm560_vm9, %v558_v16, %v497_v14  ;;  %v562_v17 = vsel %vm560_vm9, %v559_v31, %v498_v15 }
 0x1b4   : > { %v564_v18 = vsel %vm563_vm10, %v561_v37, %v387_v48  ;;  %v565_v19 = vsel %vm563_vm10, %v562_v17, %v388_v49  ;;  %v427_v3 = vpop.xlane.xlu1 %426  ;;  %v430_v2 = vpop.xlane.xlu0 %429 }
 0x1b5   : > { %v431_v11 = vmul.f32 %v1415_v33, %v427_v3  ;;  %v567_v12 = vsel %vm566_vm11, %v564_v18, %v409_v1  ;;  %v568_v20 = vsel %vm566_vm11, %v565_v19, %v410_v61  ;;  %v432_v21 = vmul.f32 %v1417_v4, %v430_v2 }
 0x1b7   : > { %v570_v22 = vsel %vm569_vm12, %v567_v12, %v431_v11  ;;  %v571_v23 = vsel %vm569_vm12, %v568_v20, %v432_v21 }
 0x1b8   : > { %v515_v6 = vpop.xlane.xlu1 %514  ;;  %v518_v8 = vpop.xlane.xlu0 %517 }
 0x1b9   : > { %v519_v24 = vmul.f32 %v1415_v33, %v515_v6  ;;  %v520_v26 = vmul.f32 %v1417_v4, %v518_v8 }
 0x1bb   : > { %v573_v27 = vsel %vm572_vm13, %v570_v22, %v519_v24  ;;  %v574_v28 = vsel %vm572_vm13, %v571_v23, %v520_v26 }
 0x1bc   : > { %v576_v29 = vsel %vm575_vm14, %v573_v27, %v475_v54  ;;  %v577_v5 = vsel %vm575_vm14, %v574_v28, %v476_v55  ;;  %v537_v38 = vpop.xlane.xlu1 %536  ;;  %v540_v39 = vpop.xlane.xlu0 %539 }
 0x1bd   : > { %v579_v34 = vsel %vm578_vm15, %v576_v29, %v497_v14  ;;  %v580_v35 = vsel %vm578_vm15, %v577_v5, %v498_v15  ;;  %v541_v40 = vmul.f32 %v1415_v33, %v537_v38  ;;  %v542_v41 = vmul.f32 %v1417_v4, %v540_v39 }
 0x1be   : > { %v582_v36 = vsel %vm581_vm3, %v579_v34, %v519_v24  ;;  %v583_v32 = vsel %vm581_vm3, %v580_v35, %v520_v26 }
 0x1bf   : > { %v584_v42 = vsel %vm291_vm1, %v582_v36, %v541_v40  ;;  %v585_v33 = vsel %vm291_vm1, %v583_v32, %v542_v41 }
 0x20e   : > { %v619_v43 = vpop.permute.xlu1 %618  ;;  %v621_v44 = vpop.permute.xlu0 %620 }
 0x20f   : > { %v624_v4 = vsel %vm233_vm0, %v584_v42, %v619_v43  ;;  %v625_v45 = vsel %vm233_vm0, %v585_v33, %v621_v44 }
 0x210   : > { %627 = vst.msk [vmem:[%s223_s8] sm:$0xff] %vm626_vm2, %v624_v4  ;;  %628 = vst.msk [vmem:[%s223_s8 + $0x8] sm:$0xff] %vm626_vm2, %v625_v45 }
 0x211   : > { %939 = shalt.err (!%p936_p11)
}
 0x212   : > { %s940_s29 = scalar_lea.hbm %s1517_s6, 256  ;;  %s944_s19 = scalar_lea.hbm %s1572_s2, 512 }
 0x213   : > { %p941_p1 = scmp.ne.s32.totalorder %s1517_s6, %s940_s29  ;;  %p945_p5 = scmp.lt.u32.totalorder %s1517_s6, %s1572_s2 }
 0x214   : > { %p946_p4 = scmp.lt.u32.totalorder %s944_s19, %s940_s29  ;;  %p948_p0 = scmp.lt.u32.totalorder %s940_s29, %s1517_s6 }
 0x215   : > { %p942_p6 = pnand %p941_p1, %p1585_p3 }
 0x216   : > { %p947_p8 = por %p946_p4, %p945_p5 }
 0x217   : > { %p943_p2 = pneg %p942_p6 }
 0x218   : > { %p949_p12 = por %p948_p0, %p947_p8 }
 0x21a   : > { %p950_p13 = pnand %p949_p12, %p943_p2 }
 0x21c   : > { %953 = shalt.err (!%p950_p13)
}
 0x21d   : > { %s1024_s30 = smov 128   ;;  %s1025_s8 = smov 8  }
 0x21e   : > { %790 = dma.vmem_to_hbm [thread:$0]  (%p1585_p3), %s1512_s16, 256, %s1517_s6, %s630_s12, %s1024_s30, %s1024_s30, %s1025_s8  }
 0x21f PF: > { %s660_s7 = sand.u32 1, %s992_s9   ;;  %p1586_p7 = scmp.ne.s32.totalorder %s1578_s24, 0 }
 0x220   : > { %p1587_p10 = scmp.ge.s32.totalorder %s1012_s14, 2  ;;  %s661_s18 = scalar_lea.sflag [#allocation4], %s660_s7 }
 0x222   : > { %p800_p9 = pnand %p1587_p10, %p1586_p7 }
 0x224   : > { %987 = dma.done.wait (!%p800_p9), %s661_s18, 256  }
 0x225   : > { %989 = vsyncadd (!%p800_p9), %s661_s18, 4294967040  ;;  %s21_s14 = sadd.s32 1, %s1012_s14   ;;  %s1588_s9 = smov %s996_s10 }
 0x226   : > { %p18_p11 = scmp.ge.s32.totalorder %s21_s14, 4   ;;  %s1589_s10 = smov %s1000_s11 }
 0x227   : > { %s1590_s11 = smov %s1097_s23  ;;  %s1591_s12 = smov %s1008_s13 }
 0x228   : > { %s1592_s13 = smov %s1594_s17  ;;  %20 = sbr.rel (!%p18_p11) target bundleno = 8 (0x8), region = 89 }
 0x22f   :  { %666 = vsyncpa [#allocation3], 1 }
 0x230   :  { %668 = vsyncpa [#allocation3 + $0x1], 1 }
 0x231   :  { %669 = vsyncpa [#allocation6], 1 }
 0x232   :  { %671 = vsyncpa [#allocation6 + $0x1], 1 }
 0x233   :  { %672 = vsyncpa [#allocation4], 1 }
 0x234   :  { %674 = vsyncpa [#allocation4 + $0x1], 1 }

</bundles_post_ra>
